<compile_context>
chip_gen: v7x
topology: tpu7x:2x2x1
jax: 0.10.0
libtpu: 0.0.40
codegen_flags: <defaults>
</compile_context>

<pallas_src>
import functools

import jax
import jax.numpy as jnp
from jax.experimental import pallas as pl
from jax.experimental.pallas import tpu as pltpu

IGNORE_VALUE = -1.0  # deterministic stand-in for config.multiDepthIgnoreValue[net_idx]


def _round_up(x: int, m: int) -> int:
    return (x + m - 1) // m * m


def _cdiv(a: int, b: int) -> int:
    return -(-a // b)


def _multi_depth_mse_kernel(outs_ref, tgts_ref, psum_ref, *,
                            ignore_value, batch_size):
    """One batch block. Layout: depth on sublanes, batch on lanes.

    outs_ref/tgts_ref: (D, block_b) in native dtype, psum_ref: (1, block_b) f32.
    Designed for small D (the module uses a handful of depth hypotheses).
    """
    D, Bb = outs_ref.shape
    blk = pl.program_id(0)

    # Working copy of the outputs; selected entries get marked "used" (+inf).
    cpy = outs_ref[...].astype(jnp.float32)                       # (D, Bb)

    # Row (= depth) index per element, packed into the low bits of the key.
    row_ids = jax.lax.broadcasted_iota(jnp.int32, (D, Bb), 0)
    idx_bits = max((D - 1).bit_length(), 1)
    hi_mask = jnp.int32(~((1 << idx_bits) - 1))

    # Ragged-tail mask: lanes past the true batch size contribute nothing
    # (their block contents are undefined padding from the edge DMA).
    lane = jax.lax.broadcasted_iota(jnp.int32, (1, Bb), 1)
    valid = (blk * Bb + lane) < batch_size                        # (1, Bb)

    inf = jnp.float32(jnp.inf)
    acc = jnp.zeros((1, Bb), jnp.float32)                         # per-lane sum

    # Greedy matching, unrolled over the small static depth.
    for i in range(D):
        # Load one target row from VMEM per iteration (keeps vreg live-set small).
        tgt_i = tgts_ref[i:i + 1, :].astype(jnp.float32)          # (1, Bb)
        diff = jnp.abs(cpy - tgt_i)                               # (D, Bb) >= 0

        # Fused min+argmin: non-negative f32 bits are order-preserving as
        # int32; clear the low idx_bits and OR in the row index so one sublane
        # min returns both the minimum |diff| (high bits) and the first-index
        # tie-break (low bits), matching torch.argmin on exact ties.
        key = (pltpu.bitcast(diff, jnp.int32) & hi_mask) | row_ids
        min_key = jnp.min(key, axis=0, keepdims=True)             # (1, Bb)

        # Keys are unique per column (distinct row ids in the low bits), so the
        # selected row is simply where key == min_key.
        onehot = key == min_key                                   # (D, Bb)
        cpy = jnp.where(onehot, inf, cpy)                         # mark used

        # The selected (unused) row always satisfies |cpy_sel - tgt| ==
        # |outputs_sel - tgt|, so the squared error is recovered straight from
        # the key's high bits (<= 2^idx_bits - 1 ULP truncation of |diff|).
        dmin = pltpu.bitcast(min_key & hi_mask, jnp.float32)      # (1, Bb)
        ok = valid & (tgt_i != ignore_value)
        acc = acc + jnp.where(ok, dmin * dmin, 0.0)

    psum_ref[...] = acc                    # lane-dense per-block partial sums


def _multi_depth_mse_pallas(outputs_t, targets_t, ignore_value, block_b):
    """Pallas path. outputs_t/targets_t: (D, B) arrays (batch on the lane axis)."""
    D, B = outputs_t.shape
    block_b = max(128, (int(block_b) // 128) * 128)   # lanes per step, mult of 128
    block_b = min(block_b, _round_up(B, 128))
    nb = _cdiv(B, block_b)

    kernel = functools.partial(_multi_depth_mse_kernel,
                               ignore_value=float(ignore_value),
                               batch_size=B)
    partial_sums = pl.pallas_call(
        kernel,
        out_shape=jax.ShapeDtypeStruct((1, nb * block_b), jnp.float32),
        grid_spec=pltpu.PrefetchScalarGridSpec(
            num_scalar_prefetch=0,
            grid=(nb,),
            in_specs=[pl.BlockSpec((D, block_b), lambda i: (0, i)),
                      pl.BlockSpec((D, block_b), lambda i: (0, i))],
            out_specs=pl.BlockSpec((1, block_b), lambda i: (0, i)),
        ),
        compiler_params=pltpu.CompilerParams(
            dimension_semantics=("parallel",)),
    )(outputs_t, targets_t)

    # Tiny final reduction in XLA; 'mean' uses the true element count B*D
    # (ignored positions count in the denominator, as in torch MSELoss).
    return jnp.sum(partial_sums) / jnp.float32(B * D)


def multi_depth_limited_mse_loss(outputs, targets,
                                 ignore_value=IGNORE_VALUE,
                                 *,
                                 block_b: int = 2048,
                                 transposed: bool = False,
                                 small_fallback_elems: int = 1 << 16):
    """MultiDepthLimitedMSELoss forward.

    outputs, targets: (B, D) float arrays (or (D, B) if transposed=True, which
    avoids the single wrapper-side transpose pass entirely).

    block_b: batch lanes per grid step. 2048 works on v5e/v6e/v7x alike (vreg
    shape and count are identical across generations; VMEM is never the
    constraint here). Keep the grid >= 2 steps for the expected B so v7x can
    split the "parallel" axis across both TensorCores.

    small_fallback_elems: inputs with B*D at or below this use a fused XLA
    implementation — a one-step pallas_call is launch/DMA-latency dominated
    for tiny inputs (including the module's typical batch=2).
    """
    assert outputs.shape == targets.shape and outputs.ndim == 2
    if transposed:
        D, B = outputs.shape
    else:
        B, D = outputs.shape

    if B * D <= small_fallback_elems:
        if transposed:
            return _reference_loss(outputs.T, targets.T, ignore_value)
        return _reference_loss(outputs, targets, ignore_value)

    outs_t = outputs if transposed else outputs.T   # (D, B), native dtype
    tgts_t = targets if transposed else targets.T
    return _multi_depth_mse_pallas(outs_t, tgts_t, ignore_value, block_b)


def _reference_loss(outputs, targets, ignore_value=IGNORE_VALUE):
    """Pure-JAX mirror of the PyTorch forward (also the small-input fast path)."""
    outputs = outputs.astype(jnp.float32)
    targets = targets.astype(jnp.float32)
    B, D = outputs.shape
    lane = jnp.arange(D)[None, :]
    cpy = outputs
    shf = jnp.zeros_like(outputs)
    for i in range(D):
        diff = jnp.abs(cpy - targets[:, i:i + 1])
        ids = jnp.argmin(diff, axis=-1)            # first index on ties
        onehot = lane == ids[:, None]
        gathered = jnp.sum(jnp.where(onehot, outputs, 0.0), axis=-1)
        cpy = jnp.where(onehot, jnp.finfo(jnp.float32).max, cpy)
        shf = shf.at[:, i].set(gathered)
    seltgt = jnp.where(targets != ignore_value, targets, shf)
    return jnp.mean((shf - seltgt) ** 2)


def _make_tie_free(key, B, D):
    """Data with well-separated diffs so greedy selection is bit-reproducible
    (the fused argmin only differs from exact argmin on sub-7-ULP near-ties)."""
    k_perm, k_tgt, k_msk = jax.random.split(key, 3)
    base = jnp.tile(jnp.arange(D, dtype=jnp.int32)[None, :], (B, 1))
    outs = jax.random.permutation(k_perm, base, axis=1,
                                  independent=True).astype(jnp.float32)
    tgts = jax.random.randint(k_tgt, (B, D), 0, D).astype(jnp.float32) + 0.25
    ign = jax.random.bernoulli(k_msk, 0.2, (B, D))
    tgts = jnp.where(ign, jnp.float32(IGNORE_VALUE), tgts)
    return outs, tgts


if __name__ == "__main__":
    key = jax.random.PRNGKey(0)

    # --- test 1: typical module shape (batch=2, depth=8) -> XLA fast path ---
    B, D = 2, 8
    k_out, k_tgt, k_msk, key = jax.random.split(key, 4)
    outputs = jax.random.uniform(k_out, (B, D), jnp.float32, 0.0, 10.0)
    targets = jax.random.uniform(k_tgt, (B, D), jnp.float32, 0.0, 10.0)
    targets = jnp.where(jax.random.bernoulli(k_msk, 0.25, (B, D)),
                        jnp.float32(IGNORE_VALUE), targets)
    loss1 = jax.block_until_ready(multi_depth_limited_mse_loss(outputs, targets))
    ref1 = _reference_loss(outputs, targets)
    assert jnp.allclose(loss1, ref1, rtol=1e-5, atol=1e-6), (loss1, ref1)

    # --- test 2: Pallas path, multi-block grid + ragged tail masking
    # (B=200 is not a multiple of 128; forced past the small-input fallback).
    key, k2 = jax.random.split(key)
    o2, t2 = _make_tie_free(k2, 200, 8)
    loss2 = jax.block_until_ready(
        multi_depth_limited_mse_loss(o2, t2, block_b=128,
                                     small_fallback_elems=0))
    ref2 = _reference_loss(o2, t2)
    assert jnp.allclose(loss2, ref2, rtol=1e-5, atol=1e-6), (loss2, ref2)

    # --- test 3: Pallas path at the default block size (ragged last block) ---
    key, k3 = jax.random.split(key)
    o3, t3 = _make_tie_free(k3, 5000, 8)
    loss3 = jax.block_until_ready(
        multi_depth_limited_mse_loss(o3, t3, block_b=2048,
                                     small_fallback_elems=0))
    ref3 = _reference_loss(o3, t3)
    assert jnp.allclose(loss3, ref3, rtol=1e-5, atol=1e-6), (loss3, ref3)

    # --- test 4: pre-transposed (D, B) inputs skip the wrapper transpose ---
    loss4 = jax.block_until_ready(
        multi_depth_limited_mse_loss(o2.T, t2.T, transposed=True,
                                     block_b=128, small_fallback_elems=0))
    assert jnp.allclose(loss4, ref2, rtol=1e-5, atol=1e-6), (loss4, ref2)

    print("KERNEL_OK")
</pallas_src>

<mosaic_0001>
module attributes {stable_mosaic.version = 11 : i64} {
  func.func @_multi_depth_mse_kernel(%arg0: i32, %arg1: memref<8x128xf32, #tpu.memory_space<vmem>>, %arg2: memref<8x128xf32, #tpu.memory_space<vmem>>, %arg3: memref<1x128xf32, #tpu.memory_space<vmem>>) attributes {dimension_semantics = [#tpu.dimension_semantics<parallel>], iteration_bounds = array<i64: 2>, scalar_prefetch = 0 : i64, scratch_operands = 0 : i64, tpu.core_type = #tpu.core_type<tc>, window_params = [{transform_indices = @transform_0, window_bounds = array<i64: 8, 128>}, {transform_indices = @transform_1, window_bounds = array<i64: 8, 128>}, {transform_indices = @transform_2, window_bounds = array<i64: 1, 128>}]} {
    %c0 = arith.constant 0 : index
    %c0_0 = arith.constant 0 : index
    %0 = vector.load %arg1[%c0, %c0_0] : memref<8x128xf32, #tpu.memory_space<vmem>>, vector<8x128xf32>
    %1 = tpu.iota {dimensions = array<i32: 0>} : vector<8x128xi32>
    %2 = tpu.iota {dimensions = array<i32: 1>} : vector<1x128xi32>
    %c128_i32 = arith.constant 128 : i32
    %3 = arith.muli %arg0, %c128_i32 : i32
    %4 = vector.broadcast %3 : i32 to vector<1x128xi32>
    %5 = arith.addi %4, %2 : vector<1x128xi32>
    %c200_i32 = arith.constant 200 : i32
    %6 = vector.broadcast %c200_i32 : i32 to vector<1x128xi32>
    %7 = arith.cmpi slt, %5, %6 : vector<1x128xi32>
    %cst = arith.constant 0.000000e+00 : f32
    %8 = vector.broadcast %cst : f32 to vector<1x128xf32>
    %c0_1 = arith.constant 0 : index
    %c0_2 = arith.constant 0 : index
    %9 = vector.load %arg2[%c0_1, %c0_2] : memref<8x128xf32, #tpu.memory_space<vmem>>, vector<1x128xf32>
    %10 = vector.broadcast %9 : vector<1x128xf32> to vector<8x128xf32>
    %11 = arith.subf %0, %10 : vector<8x128xf32>
    %12 = math.absf %11 : vector<8x128xf32>
    %13 = tpu.bitcast %12 : vector<8x128xf32> -> vector<8x128xi32>
    %c-8_i32 = arith.constant -8 : i32
    %14 = vector.broadcast %c-8_i32 : i32 to vector<8x128xi32>
    %15 = arith.andi %13, %14 : vector<8x128xi32>
    %16 = arith.ori %15, %1 : vector<8x128xi32>
    %cst_3 = arith.constant dense<2147483647> : vector<128xi32>
    %17 = vector.multi_reduction <minsi>, %16, %cst_3 [0] : vector<8x128xi32> to vector<128xi32>
    %18 = vector.shape_cast %17 : vector<128xi32> to vector<1x128xi32>
    %19 = vector.broadcast %18 : vector<1x128xi32> to vector<8x128xi32>
    %20 = arith.cmpi eq, %16, %19 : vector<8x128xi32>
    %cst_4 = arith.constant 0x7F800000 : f32
    %21 = vector.broadcast %cst_4 : f32 to vector<8x128xf32>
    %22 = arith.select %20, %21, %0 : vector<8x128xi1>, vector<8x128xf32>
    %c-8_i32_5 = arith.constant -8 : i32
    %23 = vector.broadcast %c-8_i32_5 : i32 to vector<1x128xi32>
    %24 = arith.andi %18, %23 : vector<1x128xi32>
    %25 = tpu.bitcast %24 : vector<1x128xi32> -> vector<1x128xf32>
    %cst_6 = arith.constant -1.000000e+00 : f32
    %26 = vector.broadcast %cst_6 : f32 to vector<1x128xf32>
    %27 = arith.cmpf one, %9, %26 : vector<1x128xf32>
    %28 = arith.andi %7, %27 : vector<1x128xi1>
    %29 = arith.mulf %25, %25 : vector<1x128xf32>
    %cst_7 = arith.constant 0.000000e+00 : f32
    %30 = vector.broadcast %cst_7 : f32 to vector<1x128xf32>
    %31 = arith.select %28, %29, %30 : vector<1x128xi1>, vector<1x128xf32>
    %32 = arith.addf %8, %31 : vector<1x128xf32>
    %c1 = arith.constant 1 : index
    %c0_8 = arith.constant 0 : index
    %33 = vector.load %arg2[%c1, %c0_8] : memref<8x128xf32, #tpu.memory_space<vmem>>, vector<1x128xf32>
    %34 = vector.broadcast %33 : vector<1x128xf32> to vector<8x128xf32>
    %35 = arith.subf %22, %34 : vector<8x128xf32>
    %36 = math.absf %35 : vector<8x128xf32>
    %37 = tpu.bitcast %36 : vector<8x128xf32> -> vector<8x128xi32>
    %c-8_i32_9 = arith.constant -8 : i32
    %38 = vector.broadcast %c-8_i32_9 : i32 to vector<8x128xi32>
    %39 = arith.andi %37, %38 : vector<8x128xi32>
    %40 = arith.ori %39, %1 : vector<8x128xi32>
    %cst_10 = arith.constant dense<2147483647> : vector<128xi32>
    %41 = vector.multi_reduction <minsi>, %40, %cst_10 [0] : vector<8x128xi32> to vector<128xi32>
    %42 = vector.shape_cast %41 : vector<128xi32> to vector<1x128xi32>
    %43 = vector.broadcast %42 : vector<1x128xi32> to vector<8x128xi32>
    %44 = arith.cmpi eq, %40, %43 : vector<8x128xi32>
    %cst_11 = arith.constant 0x7F800000 : f32
    %45 = vector.broadcast %cst_11 : f32 to vector<8x128xf32>
    %46 = arith.select %44, %45, %22 : vector<8x128xi1>, vector<8x128xf32>
    %c-8_i32_12 = arith.constant -8 : i32
    %47 = vector.broadcast %c-8_i32_12 : i32 to vector<1x128xi32>
    %48 = arith.andi %42, %47 : vector<1x128xi32>
    %49 = tpu.bitcast %48 : vector<1x128xi32> -> vector<1x128xf32>
    %cst_13 = arith.constant -1.000000e+00 : f32
    %50 = vector.broadcast %cst_13 : f32 to vector<1x128xf32>
    %51 = arith.cmpf one, %33, %50 : vector<1x128xf32>
    %52 = arith.andi %7, %51 : vector<1x128xi1>
    %53 = arith.mulf %49, %49 : vector<1x128xf32>
    %cst_14 = arith.constant 0.000000e+00 : f32
    %54 = vector.broadcast %cst_14 : f32 to vector<1x128xf32>
    %55 = arith.select %52, %53, %54 : vector<1x128xi1>, vector<1x128xf32>
    %56 = arith.addf %32, %55 : vector<1x128xf32>
    %c2 = arith.constant 2 : index
    %c0_15 = arith.constant 0 : index
    %57 = vector.load %arg2[%c2, %c0_15] : memref<8x128xf32, #tpu.memory_space<vmem>>, vector<1x128xf32>
    %58 = vector.broadcast %57 : vector<1x128xf32> to vector<8x128xf32>
    %59 = arith.subf %46, %58 : vector<8x128xf32>
    %60 = math.absf %59 : vector<8x128xf32>
    %61 = tpu.bitcast %60 : vector<8x128xf32> -> vector<8x128xi32>
    %c-8_i32_16 = arith.constant -8 : i32
    %62 = vector.broadcast %c-8_i32_16 : i32 to vector<8x128xi32>
    %63 = arith.andi %61, %62 : vector<8x128xi32>
    %64 = arith.ori %63, %1 : vector<8x128xi32>
    %cst_17 = arith.constant dense<2147483647> : vector<128xi32>
    %65 = vector.multi_reduction <minsi>, %64, %cst_17 [0] : vector<8x128xi32> to vector<128xi32>
    %66 = vector.shape_cast %65 : vector<128xi32> to vector<1x128xi32>
    %67 = vector.broadcast %66 : vector<1x128xi32> to vector<8x128xi32>
    %68 = arith.cmpi eq, %64, %67 : vector<8x128xi32>
    %cst_18 = arith.constant 0x7F800000 : f32
    %69 = vector.broadcast %cst_18 : f32 to vector<8x128xf32>
    %70 = arith.select %68, %69, %46 : vector<8x128xi1>, vector<8x128xf32>
    %c-8_i32_19 = arith.constant -8 : i32
    %71 = vector.broadcast %c-8_i32_19 : i32 to vector<1x128xi32>
    %72 = arith.andi %66, %71 : vector<1x128xi32>
    %73 = tpu.bitcast %72 : vector<1x128xi32> -> vector<1x128xf32>
    %cst_20 = arith.constant -1.000000e+00 : f32
    %74 = vector.broadcast %cst_20 : f32 to vector<1x128xf32>
    %75 = arith.cmpf one, %57, %74 : vector<1x128xf32>
    %76 = arith.andi %7, %75 : vector<1x128xi1>
    %77 = arith.mulf %73, %73 : vector<1x128xf32>
    %cst_21 = arith.constant 0.000000e+00 : f32
    %78 = vector.broadcast %cst_21 : f32 to vector<1x128xf32>
    %79 = arith.select %76, %77, %78 : vector<1x128xi1>, vector<1x128xf32>
    %80 = arith.addf %56, %79 : vector<1x128xf32>
    %c3 = arith.constant 3 : index
    %c0_22 = arith.constant 0 : index
    %81 = vector.load %arg2[%c3, %c0_22] : memref<8x128xf32, #tpu.memory_space<vmem>>, vector<1x128xf32>
    %82 = vector.broadcast %81 : vector<1x128xf32> to vector<8x128xf32>
    %83 = arith.subf %70, %82 : vector<8x128xf32>
    %84 = math.absf %83 : vector<8x128xf32>
    %85 = tpu.bitcast %84 : vector<8x128xf32> -> vector<8x128xi32>
    %c-8_i32_23 = arith.constant -8 : i32
    %86 = vector.broadcast %c-8_i32_23 : i32 to vector<8x128xi32>
    %87 = arith.andi %85, %86 : vector<8x128xi32>
    %88 = arith.ori %87, %1 : vector<8x128xi32>
    %cst_24 = arith.constant dense<2147483647> : vector<128xi32>
    %89 = vector.multi_reduction <minsi>, %88, %cst_24 [0] : vector<8x128xi32> to vector<128xi32>
    %90 = vector.shape_cast %89 : vector<128xi32> to vector<1x128xi32>
    %91 = vector.broadcast %90 : vector<1x128xi32> to vector<8x128xi32>
    %92 = arith.cmpi eq, %88, %91 : vector<8x128xi32>
    %cst_25 = arith.constant 0x7F800000 : f32
    %93 = vector.broadcast %cst_25 : f32 to vector<8x128xf32>
    %94 = arith.select %92, %93, %70 : vector<8x128xi1>, vector<8x128xf32>
    %c-8_i32_26 = arith.constant -8 : i32
    %95 = vector.broadcast %c-8_i32_26 : i32 to vector<1x128xi32>
    %96 = arith.andi %90, %95 : vector<1x128xi32>
    %97 = tpu.bitcast %96 : vector<1x128xi32> -> vector<1x128xf32>
    %cst_27 = arith.constant -1.000000e+00 : f32
    %98 = vector.broadcast %cst_27 : f32 to vector<1x128xf32>
    %99 = arith.cmpf one, %81, %98 : vector<1x128xf32>
    %100 = arith.andi %7, %99 : vector<1x128xi1>
    %101 = arith.mulf %97, %97 : vector<1x128xf32>
    %cst_28 = arith.constant 0.000000e+00 : f32
    %102 = vector.broadcast %cst_28 : f32 to vector<1x128xf32>
    %103 = arith.select %100, %101, %102 : vector<1x128xi1>, vector<1x128xf32>
    %104 = arith.addf %80, %103 : vector<1x128xf32>
    %c4 = arith.constant 4 : index
    %c0_29 = arith.constant 0 : index
    %105 = vector.load %arg2[%c4, %c0_29] : memref<8x128xf32, #tpu.memory_space<vmem>>, vector<1x128xf32>
    %106 = vector.broadcast %105 : vector<1x128xf32> to vector<8x128xf32>
    %107 = arith.subf %94, %106 : vector<8x128xf32>
    %108 = math.absf %107 : vector<8x128xf32>
    %109 = tpu.bitcast %108 : vector<8x128xf32> -> vector<8x128xi32>
    %c-8_i32_30 = arith.constant -8 : i32
    %110 = vector.broadcast %c-8_i32_30 : i32 to vector<8x128xi32>
    %111 = arith.andi %109, %110 : vector<8x128xi32>
    %112 = arith.ori %111, %1 : vector<8x128xi32>
    %cst_31 = arith.constant dense<2147483647> : vector<128xi32>
    %113 = vector.multi_reduction <minsi>, %112, %cst_31 [0] : vector<8x128xi32> to vector<128xi32>
    %114 = vector.shape_cast %113 : vector<128xi32> to vector<1x128xi32>
    %115 = vector.broadcast %114 : vector<1x128xi32> to vector<8x128xi32>
    %116 = arith.cmpi eq, %112, %115 : vector<8x128xi32>
    %cst_32 = arith.constant 0x7F800000 : f32
    %117 = vector.broadcast %cst_32 : f32 to vector<8x128xf32>
    %118 = arith.select %116, %117, %94 : vector<8x128xi1>, vector<8x128xf32>
    %c-8_i32_33 = arith.constant -8 : i32
    %119 = vector.broadcast %c-8_i32_33 : i32 to vector<1x128xi32>
    %120 = arith.andi %114, %119 : vector<1x128xi32>
    %121 = tpu.bitcast %120 : vector<1x128xi32> -> vector<1x128xf32>
    %cst_34 = arith.constant -1.000000e+00 : f32
    %122 = vector.broadcast %cst_34 : f32 to vector<1x128xf32>
    %123 = arith.cmpf one, %105, %122 : vector<1x128xf32>
    %124 = arith.andi %7, %123 : vector<1x128xi1>
    %125 = arith.mulf %121, %121 : vector<1x128xf32>
    %cst_35 = arith.constant 0.000000e+00 : f32
    %126 = vector.broadcast %cst_35 : f32 to vector<1x128xf32>
    %127 = arith.select %124, %125, %126 : vector<1x128xi1>, vector<1x128xf32>
    %128 = arith.addf %104, %127 : vector<1x128xf32>
    %c5 = arith.constant 5 : index
    %c0_36 = arith.constant 0 : index
    %129 = vector.load %arg2[%c5, %c0_36] : memref<8x128xf32, #tpu.memory_space<vmem>>, vector<1x128xf32>
    %130 = vector.broadcast %129 : vector<1x128xf32> to vector<8x128xf32>
    %131 = arith.subf %118, %130 : vector<8x128xf32>
    %132 = math.absf %131 : vector<8x128xf32>
    %133 = tpu.bitcast %132 : vector<8x128xf32> -> vector<8x128xi32>
    %c-8_i32_37 = arith.constant -8 : i32
    %134 = vector.broadcast %c-8_i32_37 : i32 to vector<8x128xi32>
    %135 = arith.andi %133, %134 : vector<8x128xi32>
    %136 = arith.ori %135, %1 : vector<8x128xi32>
    %cst_38 = arith.constant dense<2147483647> : vector<128xi32>
    %137 = vector.multi_reduction <minsi>, %136, %cst_38 [0] : vector<8x128xi32> to vector<128xi32>
    %138 = vector.shape_cast %137 : vector<128xi32> to vector<1x128xi32>
    %139 = vector.broadcast %138 : vector<1x128xi32> to vector<8x128xi32>
    %140 = arith.cmpi eq, %136, %139 : vector<8x128xi32>
    %cst_39 = arith.constant 0x7F800000 : f32
    %141 = vector.broadcast %cst_39 : f32 to vector<8x128xf32>
    %142 = arith.select %140, %141, %118 : vector<8x128xi1>, vector<8x128xf32>
    %c-8_i32_40 = arith.constant -8 : i32
    %143 = vector.broadcast %c-8_i32_40 : i32 to vector<1x128xi32>
    %144 = arith.andi %138, %143 : vector<1x128xi32>
    %145 = tpu.bitcast %144 : vector<1x128xi32> -> vector<1x128xf32>
    %cst_41 = arith.constant -1.000000e+00 : f32
    %146 = vector.broadcast %cst_41 : f32 to vector<1x128xf32>
    %147 = arith.cmpf one, %129, %146 : vector<1x128xf32>
    %148 = arith.andi %7, %147 : vector<1x128xi1>
    %149 = arith.mulf %145, %145 : vector<1x128xf32>
    %cst_42 = arith.constant 0.000000e+00 : f32
    %150 = vector.broadcast %cst_42 : f32 to vector<1x128xf32>
    %151 = arith.select %148, %149, %150 : vector<1x128xi1>, vector<1x128xf32>
    %152 = arith.addf %128, %151 : vector<1x128xf32>
    %c6 = arith.constant 6 : index
    %c0_43 = arith.constant 0 : index
    %153 = vector.load %arg2[%c6, %c0_43] : memref<8x128xf32, #tpu.memory_space<vmem>>, vector<1x128xf32>
    %154 = vector.broadcast %153 : vector<1x128xf32> to vector<8x128xf32>
    %155 = arith.subf %142, %154 : vector<8x128xf32>
    %156 = math.absf %155 : vector<8x128xf32>
    %157 = tpu.bitcast %156 : vector<8x128xf32> -> vector<8x128xi32>
    %c-8_i32_44 = arith.constant -8 : i32
    %158 = vector.broadcast %c-8_i32_44 : i32 to vector<8x128xi32>
    %159 = arith.andi %157, %158 : vector<8x128xi32>
    %160 = arith.ori %159, %1 : vector<8x128xi32>
    %cst_45 = arith.constant dense<2147483647> : vector<128xi32>
    %161 = vector.multi_reduction <minsi>, %160, %cst_45 [0] : vector<8x128xi32> to vector<128xi32>
    %162 = vector.shape_cast %161 : vector<128xi32> to vector<1x128xi32>
    %163 = vector.broadcast %162 : vector<1x128xi32> to vector<8x128xi32>
    %164 = arith.cmpi eq, %160, %163 : vector<8x128xi32>
    %cst_46 = arith.constant 0x7F800000 : f32
    %165 = vector.broadcast %cst_46 : f32 to vector<8x128xf32>
    %166 = arith.select %164, %165, %142 : vector<8x128xi1>, vector<8x128xf32>
    %c-8_i32_47 = arith.constant -8 : i32
    %167 = vector.broadcast %c-8_i32_47 : i32 to vector<1x128xi32>
    %168 = arith.andi %162, %167 : vector<1x128xi32>
    %169 = tpu.bitcast %168 : vector<1x128xi32> -> vector<1x128xf32>
    %cst_48 = arith.constant -1.000000e+00 : f32
    %170 = vector.broadcast %cst_48 : f32 to vector<1x128xf32>
    %171 = arith.cmpf one, %153, %170 : vector<1x128xf32>
    %172 = arith.andi %7, %171 : vector<1x128xi1>
    %173 = arith.mulf %169, %169 : vector<1x128xf32>
    %cst_49 = arith.constant 0.000000e+00 : f32
    %174 = vector.broadcast %cst_49 : f32 to vector<1x128xf32>
    %175 = arith.select %172, %173, %174 : vector<1x128xi1>, vector<1x128xf32>
    %176 = arith.addf %152, %175 : vector<1x128xf32>
    %c7 = arith.constant 7 : index
    %c0_50 = arith.constant 0 : index
    %177 = vector.load %arg2[%c7, %c0_50] : memref<8x128xf32, #tpu.memory_space<vmem>>, vector<1x128xf32>
    %178 = vector.broadcast %177 : vector<1x128xf32> to vector<8x128xf32>
    %179 = arith.subf %166, %178 : vector<8x128xf32>
    %180 = math.absf %179 : vector<8x128xf32>
    %181 = tpu.bitcast %180 : vector<8x128xf32> -> vector<8x128xi32>
    %c-8_i32_51 = arith.constant -8 : i32
    %182 = vector.broadcast %c-8_i32_51 : i32 to vector<8x128xi32>
    %183 = arith.andi %181, %182 : vector<8x128xi32>
    %184 = arith.ori %183, %1 : vector<8x128xi32>
    %cst_52 = arith.constant dense<2147483647> : vector<128xi32>
    %185 = vector.multi_reduction <minsi>, %184, %cst_52 [0] : vector<8x128xi32> to vector<128xi32>
    %186 = vector.shape_cast %185 : vector<128xi32> to vector<1x128xi32>
    %c-8_i32_53 = arith.constant -8 : i32
    %187 = vector.broadcast %c-8_i32_53 : i32 to vector<1x128xi32>
    %188 = arith.andi %186, %187 : vector<1x128xi32>
    %189 = tpu.bitcast %188 : vector<1x128xi32> -> vector<1x128xf32>
    %cst_54 = arith.constant -1.000000e+00 : f32
    %190 = vector.broadcast %cst_54 : f32 to vector<1x128xf32>
    %191 = arith.cmpf one, %177, %190 : vector<1x128xf32>
    %192 = arith.andi %7, %191 : vector<1x128xi1>
    %193 = arith.mulf %189, %189 : vector<1x128xf32>
    %cst_55 = arith.constant 0.000000e+00 : f32
    %194 = vector.broadcast %cst_55 : f32 to vector<1x128xf32>
    %195 = arith.select %192, %193, %194 : vector<1x128xi1>, vector<1x128xf32>
    %196 = arith.addf %176, %195 : vector<1x128xf32>
    %c0_56 = arith.constant 0 : index
    %c0_57 = arith.constant 0 : index
    %197 = vector.load %arg3[%c0_56, %c0_57] : memref<1x128xf32, #tpu.memory_space<vmem>>, vector<1x128xf32>
    tpu.vector_store %arg3[%c0_56, %c0_57], %196 {strides = array<i32>} : memref<1x128xf32, #tpu.memory_space<vmem>>, vector<1x128xf32>,
    return
  }
  func.func @transform_0(%arg0: i32) -> (i32, i32) {
    %c0_i32 = arith.constant 0 : i32
    %c0_i32_0 = arith.constant 0 : i32
    return %c0_i32, %arg0 : i32, i32
  }
  func.func @transform_1(%arg0: i32) -> (i32, i32) {
    %c0_i32 = arith.constant 0 : i32
    %c0_i32_0 = arith.constant 0 : i32
    return %c0_i32, %arg0 : i32, i32
  }
  func.func @transform_2(%arg0: i32) -> (i32, i32) {
    %c0_i32 = arith.constant 0 : i32
    %c0_i32_0 = arith.constant 0 : i32
    return %c0_i32, %arg0 : i32, i32
  }
}

</mosaic_0001>

<bundles_post_ra>
// kernel: tpu_custom_call.1
= control target key start
LH: loop header
LB: loop body
LE: loop exit
PB: predicated region body
PF: predicated region fallthrough
CT: control target
= control target key end

     0   :  { %7 = vsyncpa [#allocation3], 0  ;;  %s1053_s0 = inlined_call_operand.hbm [shape: f32[8,200], index: 0, kind: input, shape index: {}]   ;;  %s1054_s1 = inlined_call_operand.hbm [shape: f32[8,200], index: 1, kind: input, shape index: {}]   ;;  %s1055_s2 = inlined_call_operand.hbm [shape: f32[1,256], index: 2, kind: output, shape index: {}]  }
   0x1   :  { %9 = vsyncpa [#allocation3 + $0x1], 0 }
   0x2   :  { %10 = vsyncpa [#allocation6], 0 }
   0x3   :  { %12 = vsyncpa [#allocation6 + $0x1], 0 }
   0x4   :  { %13 = vsyncpa [#allocation4], 0 }
   0x5   :  { %15 = vsyncpa [#allocation4 + $0x1], 0  ;;  %s744_s9 = smov 0   ;;  %s746_s10 = smov 0  }
   0x6   :  { %s748_s11 = smov 0   ;;  %s750_s12 = smov 0  }
   0x7 LB: > { %s765_s13 = sadd.s32 4294967295, %s724_s12   ;;  %s529_s14 = sadd.s32 4294967294, %s724_s12   ;;  %s724_s12 = sphi %s750_s12, %s1086_s12   ;;  %s720_s11 = sphi %s748_s11, %s1085_s11   ;;  %s716_s10 = sphi %s746_s10, %s1084_s10   ;;  %s712_s9 = sphi %s744_s9, %s1083_s9  }
   0x8   : > { %s769_s15 = sadd.s32 1, %s724_s12   ;;  %s28_s16 = sadd.s32 1, %s720_s11 }
   0x9   : > { %s25_s17 = ssub.s32 %s724_s12, %s769_s15  ;;  %p35_p0 = scmp.ne.s32.totalorder %s720_s11, %s716_s10 }
   0xa   : > { %p26_p1 = scmp.eq.s32.totalorder %s25_s17, 0  ;;  %p36_p2 = scmp.eq.s32.totalorder %s724_s12, 0 }
   0xb   : > { %p41_p3 = scmp.ne.s32.totalorder %s716_s10, %s712_s9  ;;  %p42_p4 = scmp.eq.s32.totalorder %s765_s13, 0 }
   0xc   : > { %s781_s18 = scalar_select %p26_p1, %s720_s11, %s28_s16  }
   0xd   : > { %p783_p5 = por %p36_p2, %p35_p0  ;;  %p787_p6 = por %p42_p4, %p41_p3 }
   0xe   : > { %p91_p7 = scmp.eq.s32.totalorder %s765_s13, 1  ;;  %p97_p8 = scmp.eq.s32.totalorder %s529_s14, 1 }
   0xf   : > { %s1059_s20 = scalar_select %p787_p6, 1, 0 }
  0x10   : > { %p560_p10 = scmp.lt.s32.totalorder %s724_s12, 2  ;;  %p794_p11 = por %p91_p7, %p35_p0 }
  0x11   : > { %p798_p12 = por %p97_p8, %p41_p3  ;;  %s803_s23 = sand.u32 1, %s720_s11  }
  0x12   : > { %s1060_s21 = scalar_select %p794_p11, 1, 0 }
  0x13   : > { %s1061_s22 = scalar_select %p798_p12, 1, 0 }
  0x14   : > { %s533_s24 = sshll.u32 %s724_s12, 7  ;;  %s532_s25 = sshll.u32 %s803_s23, 3 }
  0x15   : > { %s812_s28 = scalar_lea.hbm %s1053_s0, %s533_s24  ;;  %s121_s29 = scalar_lea.vmem [#allocation2], %s532_s25 }
  0x16   : > { %s128_s30 = sshll.u32 %s121_s29, 4  ;;  %p818_p13 = pnand %p560_p10, %p783_p5  ;;  %s822_s30 = int_to_ptr.vmem [resolvable:$true] %s128_s30 }
  0x17   : > { %s118_s4 = scalar_lea.sflag [#allocation3], %s803_s23  ;;  %s594_s5 = scalar_lea.hbm %s812_s28, 128 }
  0x18   : > { %p595_p2 = scmp.ne.s32.totalorder %s812_s28, %s594_s5  ;;  %p596_p3 = pneg %p818_p13 }
  0x19   : > { %s599_s8 = scalar_lea.hbm %s1053_s0, 256  ;;  %p600_p5 = scmp.lt.u32.totalorder %s812_s28, %s1053_s0 }
  0x1a   : > { %p597_p4 = pnand %p596_p3, %p595_p2  ;;  %p601_p8 = scmp.lt.u32.totalorder %s599_s8, %s594_s5 }
  0x1b   : > { %p603_p9 = scmp.lt.u32.totalorder %s594_s5, %s812_s28 }
  0x1c   : > { %p598_p7 = pneg %p597_p4  ;;  %p602_p10 = por %p601_p8, %p600_p5 }
  0x1e   : > { %p604_p0 = por %p603_p9, %p602_p10 }
  0x20   : > { %p605_p1 = pnand %p604_p0, %p598_p7 }
  0x22   : > { %608 = shalt.err (!%p605_p1)
}
  0x23   : > { %s609_s17 = scalar_lea.vmem %s822_s30, 128  ;;  %s726_s19 = smov [#allocation2]  }
  0x24   : > { %p610_p2 = scmp.ne.s32.totalorder %s822_s30, %s609_s17  ;;  %s614_s26 = sshll.u32 %s726_s19, 4  ;;  %s615_s26 = int_to_ptr.vmem [resolvable:$false] %s614_s26 }
  0x25   : > { %s616_s27 = scalar_lea.vmem %s615_s26, 256  ;;  %p617_p11 = scmp.lt.s32.totalorder %s822_s30, %s615_s26 }
  0x26   : > { %p612_p4 = pnand %p610_p2, %p596_p3  ;;  %p618_p5 = scmp.lt.s32.totalorder %s616_s27, %s609_s17 }
  0x28   : > { %p613_p12 = pneg %p612_p4  ;;  %p619_p8 = por %p618_p5, %p617_p11 }
  0x2a   : > { %p620_p9 = pnand %p619_p8, %p613_p12 }
  0x2c   : > { %623 = shalt.err (!%p620_p9)
}
  0x2d   : > { %552 = dma.hbm_to_vmem [thread:$0]  (!%p818_p13), %s812_s28, 128, %s822_s30, %s118_s4  }
  0x2e   : > { %p1063_p0 = scmp.lt.s32.totalorder %s724_s12, 3  ;;  %p1064_p1 = scmp.ge.s32.totalorder %s724_s12, 1 }
  0x2f   : > { %s865_s7 = scalar_lea.hbm %s1054_s1, %s533_s24  ;;  %s139_s8 = scalar_lea.vmem [#allocation5], %s532_s25 }
  0x30   : > { %p856_p7 = pnand %p1064_p1, %p1063_p0  ;;  %s146_s14 = sshll.u32 %s139_s8, 4  ;;  %s147_s14 = int_to_ptr.vmem [resolvable:$true] %s146_s14 }
  0x31   : > { %s136_s28 = scalar_lea.sflag [#allocation6], %s803_s23  ;;  %s624_s30 = scalar_lea.hbm %s865_s7, 128 }
  0x32   : > { %s1065_s29 = scalar_select %p856_p7, 1, 0 }
  0x33   : > { %p625_p11 = scmp.ne.s32.totalorder %s865_s7, %s624_s30  ;;  %s629_s24 = scalar_lea.hbm %s1054_s1, 256 }
  0x34   : > { %p630_p2 = scmp.lt.u32.totalorder %s865_s7, %s1054_s1  ;;  %p631_p4 = scmp.lt.u32.totalorder %s629_s24, %s624_s30 }
  0x35   : > { %p627_p12 = pnand %p625_p11, %p596_p3  ;;  %p633_p8 = scmp.lt.u32.totalorder %s624_s30, %s865_s7 }
  0x36   : > { %p632_p5 = por %p631_p4, %p630_p2 }
  0x37   : > { %p628_p10 = pneg %p627_p12 }
  0x38   : > { %p634_p9 = por %p633_p8, %p632_p5 }
  0x3a   : > { %p635_p0 = pnand %p634_p9, %p628_p10 }
  0x3c   : > { %638 = shalt.err (!%p635_p0)
}
  0x3d   : > { %s639_s23 = scalar_lea.vmem %s147_s14, 128  ;;  %s727_s25 = smov [#allocation5]  }
  0x3e   : > { %p640_p1 = scmp.ne.s32.totalorder %s147_s14, %s639_s23  ;;  %s644_s26 = sshll.u32 %s727_s25, 4  ;;  %s645_s26 = int_to_ptr.vmem [resolvable:$false] %s644_s26 }
  0x3f   : > { %s646_s27 = scalar_lea.vmem %s645_s26, 256  ;;  %p647_p6 = scmp.lt.s32.totalorder %s147_s14, %s645_s26 }
  0x40   : > { %p642_p11 = pnand %p640_p1, %p596_p3  ;;  %p648_p7 = scmp.lt.s32.totalorder %s646_s27, %s639_s23 }
  0x42   : > { %p643_p12 = pneg %p642_p11  ;;  %p649_p2 = por %p648_p7, %p647_p6 }
  0x44   : > { %p650_p4 = pnand %p649_p2, %p643_p12 }
  0x46   : > { %653 = shalt.err (!%p650_p4)
}
  0x47   : > { %555 = dma.hbm_to_vmem [thread:$0]  (!%p818_p13), %s865_s7, 128, %s147_s14, %s136_s28  }
  0x48   : > { %p1066_p10 = scmp.ne.s32.totalorder %s1065_s29, 0 }
  0x49   : > { %s892_s5 = sand.u32 (!%p1066_p10), 1, %s716_s10   ;;  %p1067_p3 = scmp.ne.s32.totalorder (!%p1066_p10), %s1059_s20, 0 }
  0x4a   : > { %155 = sbr.rel (%p1066_p10) target bundleno = 287 (0x11f), region = 28  ;;  %s537_s6 = sshll.u32 (!%p1066_p10), %s892_s5, 3 }
  0x4b   : > { %s158_s8 = scalar_lea.sflag (!%p1066_p10), [#allocation3], %s892_s5  ;;  %s161_s30 = scalar_lea.vmem (!%p1066_p10), [#allocation2], %s537_s6 }
  0x51   : > { %699 = dma.done.wait (%p1067_p3), %s158_s8, 128  }
  0x52   : > { %701 = vsyncadd (%p1067_p3), %s158_s8, 4294967168  ;;  %s167_s3 = scalar_lea.sflag [#allocation6], %s892_s5  ;;  %s901_s7 = scalar_lea.vmem [#allocation5], %s537_s6 }
  0x53   : > { %703 = dma.done.wait (%p1067_p3), %s167_s3, 128  }
  0x54   : > { %705 = vsyncadd (%p1067_p3), %s167_s3, 4294967168  ;;  %v196_v0 = vlaneseq  ;;  %s539_s29 = sshll.u32 %s765_s13, 7  ;;  %v195_v6 = vld [vmem:[%s161_s30] sm:$0xff]  ;;  %v204_v7 = vld [vmem:[%s901_s7] sm:$0x1]  ;;  %s540_s20 = sshll.u32 %s765_s13, 4 }
  0x55   : > { %v201_v1 = vstv %s539_s29  ;;  %v232_v8 = vld [vmem:[%s901_s7 + $0x1] sm:$0x1]  ;;  %vm227_vm1 = vcmp.ne.f32.partialorder %v204_v7, -1.0  ;;  %v260_v10 = vld [vmem:[%s901_s7 + $0x2] sm:$0x1]  ;;  %s194_s14 = scalar_lea.vmem [#allocation7], %s892_s5  ;;  %s1009_s24 = scalar_lea.hbm %s1055_s2, %s540_s20 }
  0x56   : > { %v908_v2 = vshrl.u32 %v196_v0, 7  ;;  %v199_v3 = vand.u32 127, %v196_v0  ;;  %vm255_vm2 = vcmp.ne.f32.partialorder %v232_v8, -1.0  ;;  %v921_v11 = vld [vmem:[%s901_s7 + $0x3] sm:$0x1]  ;;  %vm283_vm4 = vcmp.ne.f32.partialorder %v260_v10, -1.0 }
  0x57   : > { %vm311_vm5 = vcmp.ne.f32.partialorder %v921_v11, -1.0  ;;  %v931_v13 = vld [vmem:[%s901_s7 + $0x4] sm:$0x1]  ;;  %v953_v19 = vld [vmem:[%s901_s7 + $0x5] sm:$0x1]  ;;  %s440_s28 = sshll.u32 %s194_s14, 4  ;;  %s1011_s28 = int_to_ptr.vmem [resolvable:$true] %s440_s28 }
  0x58   : > { %v910_v4 = vadd.s32 %v201_v1, %v199_v3  ;;  %v913_v5 = vsub.s32 0, %v908_v2  ;;  %vm339_vm7 = vcmp.ne.f32.partialorder %v931_v13, -1.0  ;;  %vm367_vm11 = vcmp.ne.f32.partialorder %v953_v19, -1.0  ;;  %s428_s17 = scalar_lea.sflag [#allocation4], %s892_s5  ;;  %s654_s19 = scalar_lea.vmem %s1011_s28, 16 }
  0x59   : > { %p655_p6 = scmp.ne.s32.totalorder %s1011_s28, %s654_s19  ;;  %p1080_p13 = scmp.ne.s32.totalorder %s1060_s21, 0 }
  0x5a   : > { %vm203_vm0 = vcmp.lt.s32.totalorder %v910_v4, 200  ;;  %v208_v9 = vrot.slane %v204_v7, %v913_v5  ;;  %v236_v29 = vrot.slane %v232_v8, %v913_v5  ;;  %v264_v44 = vrot.slane %v260_v10, %v913_v5  ;;  %s728_s13 = smov [#allocation7]  }
  0x5b   : > { %vm925_vm3 = vmand %vm203_vm0, %vm227_vm1  ;;  %v292_v60 = vrot.slane %v921_v11, %v913_v5  ;;  %p656_p7 = pnand %p655_p6, %p1080_p13  ;;  %s658_s23 = sshll.u32 %s728_s13, 4  ;;  %s659_s23 = int_to_ptr.vmem [resolvable:$false] %s658_s23 }
  0x5c   : > { %v209_v14 = vsub.f32 %v195_v6, %v208_v9  ;;  %vm935_vm6 = vmand %vm203_vm0, %vm255_vm2  ;;  %s660_s25 = scalar_lea.vmem %s659_s23, 32  ;;  %p661_p8 = scmp.lt.s32.totalorder %s1011_s28, %s659_s23 }
  0x5d   : > { %vm942_vm8 = vmand %vm203_vm0, %vm283_vm4  ;;  %p657_p5 = pneg %p656_p7  ;;  %p662_p9 = scmp.lt.s32.totalorder %s660_s25, %s654_s19 }
  0x5e   : > { %v210_v17 = vand.u32 2147483647, %v209_v14  ;;  %vm948_vm9 = vmand %vm203_vm0, %vm311_vm5 }
  0x5f   : > { %vm957_vm10 = vmand %vm203_vm0, %vm339_vm7  ;;  %p663_p0 = por %p662_p9, %p661_p8 }
  0x60   : > { %v212_v21 = vand.u32 4294967288, %v210_v17  ;;  %vm964_vm12 = vmand %vm203_vm0, %vm367_vm11  ;;  %v320_v17 = vrot.slane %v931_v13, %v913_v5 }
  0x61   : > { %p664_p1 = pnand %p663_p0, %p657_p5 }
  0x62   : > { %v213_v23 = vor.u32 %v212_v21, %v908_v2 }
  0x64   : > { %v214_v24 = vrot.slane %v213_v23, 4 }
  0x66   : > { %vm215_vm13 = vcmp.lt.s32.totalorder %v213_v23, %v214_v24 }
  0x67   : > { %v216_v25 = vsel %vm215_vm13, %v213_v23, %v214_v24 }
  0x68   : > { %v217_v26 = vrot.slane %v216_v25, 2 }
  0x6a   : > { %vm218_vm14 = vcmp.lt.s32.totalorder %v216_v25, %v217_v26 }
  0x6b   : > { %v219_v27 = vsel %vm218_vm14, %v216_v25, %v217_v26 }
  0x6c   : > { %v220_v28 = vrot.slane %v219_v27, 1 }
  0x6e   : > { %vm221_vm15 = vcmp.lt.s32.totalorder %v219_v27, %v220_v28 }
  0x6f   : > { %v222_v30 = vsel %vm221_vm15, %v219_v27, %v220_v28 }
  0x70   : > { %vm223_vm1 = vcmp.eq.s32.totalorder %v213_v23, %v222_v30  ;;  %v225_v31 = vand.u32 4294967288, %v222_v30 }
  0x71   : > { %v224_v32 = vsel %vm223_vm1, inf, %v195_v6 }
  0x72   : > { %v229_v33 = vmul.f32 %v225_v31, %v225_v31  ;;  %v237_v34 = vsub.f32 %v224_v32, %v236_v29 }
  0x74   : > { %v230_v35 = vsel %vm925_vm3, %v229_v33, 0.0  ;;  %v238_v36 = vand.u32 2147483647, %v237_v34 }
  0x76   : > { %v240_v37 = vand.u32 4294967288, %v238_v36 }
  0x78   : > { %v241_v38 = vor.u32 %v240_v37, %v908_v2 }
  0x7a   : > { %v242_v39 = vrot.slane %v241_v38, 4 }
  0x7c   : > { %vm243_vm2 = vcmp.lt.s32.totalorder %v241_v38, %v242_v39 }
  0x7d   : > { %v244_v40 = vsel %vm243_vm2, %v241_v38, %v242_v39 }
  0x7e   : > { %v245_v41 = vrot.slane %v244_v40, 2 }
  0x80   : > { %vm246_vm4 = vcmp.lt.s32.totalorder %v244_v40, %v245_v41 }
  0x81   : > { %v247_v42 = vsel %vm246_vm4, %v244_v40, %v245_v41 }
  0x82   : > { %v248_v43 = vrot.slane %v247_v42, 1 }
  0x84   : > { %vm249_vm5 = vcmp.lt.s32.totalorder %v247_v42, %v248_v43 }
  0x85   : > { %v250_v45 = vsel %vm249_vm5, %v247_v42, %v248_v43 }
  0x86   : > { %vm251_vm7 = vcmp.eq.s32.totalorder %v241_v38, %v250_v45  ;;  %v253_v46 = vand.u32 4294967288, %v250_v45 }
  0x87   : > { %v252_v47 = vsel %vm251_vm7, inf, %v224_v32 }
  0x88   : > { %v257_v48 = vmul.f32 %v253_v46, %v253_v46  ;;  %v265_v49 = vsub.f32 %v252_v47, %v264_v44 }
  0x8a   : > { %v258_v50 = vsel %vm935_vm6, %v257_v48, 0.0  ;;  %v266_v51 = vand.u32 2147483647, %v265_v49  ;;  %v372_v48 = vld [vmem:[%s901_s7 + $0x6] sm:$0x1] }
  0x8b   : > { %v259_v52 = vadd.f32 %v258_v50, %v230_v35  ;;  %v348_v35 = vrot.slane %v953_v19, %v913_v5  ;;  %v376_v50 = vrot.slane %v372_v48, %v913_v5 }
  0x8c   : > { %v268_v53 = vand.u32 4294967288, %v266_v51 }
  0x8e   : > { %v269_v54 = vor.u32 %v268_v53, %v908_v2 }
  0x90   : > { %v270_v55 = vrot.slane %v269_v54, 4 }
  0x92   : > { %vm271_vm3 = vcmp.lt.s32.totalorder %v269_v54, %v270_v55 }
  0x93   : > { %v272_v56 = vsel %vm271_vm3, %v269_v54, %v270_v55 }
  0x94   : > { %v273_v57 = vrot.slane %v272_v56, 2 }
  0x96   : > { %vm274_vm11 = vcmp.lt.s32.totalorder %v272_v56, %v273_v57 }
  0x97   : > { %v275_v58 = vsel %vm274_vm11, %v272_v56, %v273_v57 }
  0x98   : > { %v276_v59 = vrot.slane %v275_v58, 1 }
  0x9a   : > { %vm277_vm13 = vcmp.lt.s32.totalorder %v275_v58, %v276_v59 }
  0x9b   : > { %v278_v61 = vsel %vm277_vm13, %v275_v58, %v276_v59 }
  0x9c   : > { %vm279_vm14 = vcmp.eq.s32.totalorder %v269_v54, %v278_v61  ;;  %v281_v62 = vand.u32 4294967288, %v278_v61 }
  0x9d   : > { %v280_v63 = vsel %vm279_vm14, inf, %v252_v47 }
  0x9e   : > { %v285_v0 = vmul.f32 %v281_v62, %v281_v62  ;;  %v293_v1 = vsub.f32 %v280_v63, %v292_v60 }
  0xa0   : > { %v286_v3 = vsel %vm942_vm8, %v285_v0, 0.0  ;;  %v294_v6 = vand.u32 2147483647, %v293_v1  ;;  %v400_v0 = vld [vmem:[%s901_s7 + $0x7] sm:$0x1] }
  0xa1   : > { %v287_v7 = vadd.f32 %v286_v3, %v259_v52  ;;  %v404_v3 = vrot.slane %v400_v0, %v913_v5 }
  0xa2   : > { %v296_v8 = vand.u32 4294967288, %v294_v6 }
  0xa4   : > { %v297_v9 = vor.u32 %v296_v8, %v908_v2 }
  0xa6   : > { %v298_v10 = vrot.slane %v297_v9, 4 }
  0xa8   : > { %vm299_vm6 = vcmp.lt.s32.totalorder %v297_v9, %v298_v10 }
  0xa9   : > { %v300_v12 = vsel %vm299_vm6, %v297_v9, %v298_v10 }
  0xaa   : > { %v301_v14 = vrot.slane %v300_v12, 2 }
  0xac   : > { %vm302_vm15 = vcmp.lt.s32.totalorder %v300_v12, %v301_v14 }
  0xad   : > { %v303_v11 = vsel %vm302_vm15, %v300_v12, %v301_v14  ;;  %vm395_vm15 = vcmp.ne.f32.partialorder %v372_v48, -1.0 }
  0xae   : > { %v304_v15 = vrot.slane %v303_v11, 1 }
  0xb0   : > { %vm305_vm1 = vcmp.lt.s32.totalorder %v303_v11, %v304_v15 }
  0xb1   : > { %v306_v21 = vsel %vm305_vm1, %v303_v11, %v304_v15 }
  0xb2   : > { %vm307_vm2 = vcmp.eq.s32.totalorder %v297_v9, %v306_v21  ;;  %v309_v16 = vand.u32 4294967288, %v306_v21 }
  0xb3   : > { %v308_v23 = vsel %vm307_vm2, inf, %v280_v63 }
  0xb4   : > { %v313_v24 = vmul.f32 %v309_v16, %v309_v16  ;;  %v321_v25 = vsub.f32 %v308_v23, %v320_v17 }
  0xb6   : > { %v314_v26 = vsel %vm948_vm9, %v313_v24, 0.0  ;;  %v322_v27 = vand.u32 2147483647, %v321_v25 }
  0xb7   : > { %v315_v28 = vadd.f32 %v314_v26, %v287_v7 }
  0xb8   : > { %v324_v29 = vand.u32 4294967288, %v322_v27 }
  0xba   : > { %v325_v30 = vor.u32 %v324_v29, %v908_v2 }
  0xbc   : > { %v326_v31 = vrot.slane %v325_v30, 4 }
  0xbe   : > { %vm327_vm8 = vcmp.lt.s32.totalorder %v325_v30, %v326_v31 }
  0xbf   : > { %v328_v32 = vsel %vm327_vm8, %v325_v30, %v326_v31 }
  0xc0   : > { %v329_v33 = vrot.slane %v328_v32, 2 }
  0xc2   : > { %vm330_vm4 = vcmp.lt.s32.totalorder %v328_v32, %v329_v33 }
  0xc3   : > { %v331_v13 = vsel %vm330_vm4, %v328_v32, %v329_v33 }
  0xc4   : > { %v332_v34 = vrot.slane %v331_v13, 1 }
  0xc6   : > { %vm333_vm5 = vcmp.lt.s32.totalorder %v331_v13, %v332_v34 }
  0xc7   : > { %v334_v36 = vsel %vm333_vm5, %v331_v13, %v332_v34  ;;  %vm421_vm5 = vcmp.ne.f32.partialorder %v400_v0, -1.0 }
  0xc8   : > { %vm335_vm7 = vcmp.eq.s32.totalorder %v325_v30, %v334_v36  ;;  %v337_v18 = vand.u32 4294967288, %v334_v36 }
  0xc9   : > { %v336_v37 = vsel %vm335_vm7, inf, %v308_v23  ;;  %vm422_vm7 = vmand %vm203_vm0, %vm421_vm5 }
  0xca   : > { %v341_v38 = vmul.f32 %v337_v18, %v337_v18  ;;  %v349_v39 = vsub.f32 %v336_v37, %v348_v35 }
  0xcc   : > { %v342_v40 = vsel %vm957_vm10, %v341_v38, 0.0  ;;  %v350_v41 = vand.u32 2147483647, %v349_v39 }
  0xcd   : > { %v343_v42 = vadd.f32 %v342_v40, %v315_v28 }
  0xce   : > { %v352_v43 = vand.u32 4294967288, %v350_v41 }
  0xd0   : > { %v353_v44 = vor.u32 %v352_v43, %v908_v2 }
  0xd2   : > { %v354_v45 = vrot.slane %v353_v44, 4 }
  0xd4   : > { %vm355_vm9 = vcmp.lt.s32.totalorder %v353_v44, %v354_v45 }
  0xd5   : > { %v356_v46 = vsel %vm355_vm9, %v353_v44, %v354_v45 }
  0xd6   : > { %v357_v47 = vrot.slane %v356_v46, 2 }
  0xd8   : > { %vm358_vm3 = vcmp.lt.s32.totalorder %v356_v46, %v357_v47 }
  0xd9   : > { %v359_v19 = vsel %vm358_vm3, %v356_v46, %v357_v47 }
  0xda   : > { %v360_v49 = vrot.slane %v359_v19, 1 }
  0xdc   : > { %vm361_vm11 = vcmp.lt.s32.totalorder %v359_v19, %v360_v49 }
  0xdd   : > { %v362_v51 = vsel %vm361_vm11, %v359_v19, %v360_v49 }
  0xde   : > { %vm363_vm13 = vcmp.eq.s32.totalorder %v353_v44, %v362_v51  ;;  %v365_v20 = vand.u32 4294967288, %v362_v51 }
  0xdf   : > { %v364_v52 = vsel %vm363_vm13, inf, %v336_v37 }
  0xe0   : > { %v369_v53 = vmul.f32 %v365_v20, %v365_v20  ;;  %v377_v54 = vsub.f32 %v364_v52, %v376_v50 }
  0xe2   : > { %v370_v55 = vsel %vm964_vm12, %v369_v53, 0.0  ;;  %v378_v56 = vand.u32 2147483647, %v377_v54  ;;  %vm396_vm12 = vmand %vm203_vm0, %vm395_vm15 }
  0xe3   : > { %v371_v57 = vadd.f32 %v370_v55, %v343_v42 }
  0xe4   : > { %v380_v58 = vand.u32 4294967288, %v378_v56 }
  0xe6   : > { %v381_v59 = vor.u32 %v380_v58, %v908_v2 }
  0xe8   : > { %v382_v60 = vrot.slane %v381_v59, 4 }
  0xea   : > { %vm383_vm10 = vcmp.lt.s32.totalorder %v381_v59, %v382_v60 }
  0xeb   : > { %v384_v61 = vsel %vm383_vm10, %v381_v59, %v382_v60 }
  0xec   : > { %v385_v62 = vrot.slane %v384_v61, 2 }
  0xee   : > { %vm386_vm14 = vcmp.lt.s32.totalorder %v384_v61, %v385_v62 }
  0xef   : > { %v387_v63 = vsel %vm386_vm14, %v384_v61, %v385_v62 }
  0xf0   : > { %v388_v1 = vrot.slane %v387_v63, 1 }
  0xf2   : > { %vm389_vm6 = vcmp.lt.s32.totalorder %v387_v63, %v388_v1 }
  0xf3   : > { %v390_v6 = vsel %vm389_vm6, %v387_v63, %v388_v1 }
  0xf4   : > { %vm391_vm1 = vcmp.eq.s32.totalorder %v381_v59, %v390_v6  ;;  %v393_v22 = vand.u32 4294967288, %v390_v6 }
  0xf5   : > { %v392_v7 = vsel %vm391_vm1, inf, %v364_v52 }
  0xf6   : > { %v397_v8 = vmul.f32 %v393_v22, %v393_v22  ;;  %v405_v9 = vsub.f32 %v392_v7, %v404_v3 }
  0xf8   : > { %v398_v10 = vsel %vm396_vm12, %v397_v8, 0.0  ;;  %v406_v12 = vand.u32 2147483647, %v405_v9 }
  0xf9   : > { %v399_v14 = vadd.f32 %v398_v10, %v371_v57 }
  0xfa   : > { %v408_v11 = vand.u32 4294967288, %v406_v12 }
  0xfc   : > { %v409_v15 = vor.u32 %v408_v11, %v908_v2 }
  0xfe   : > { %v410_v17 = vrot.slane %v409_v15, 4 }
 0x100   : > { %vm411_vm2 = vcmp.lt.s32.totalorder %v409_v15, %v410_v17 }
 0x101   : > { %v412_v5 = vsel %vm411_vm2, %v409_v15, %v410_v17 }
 0x102   : > { %v413_v21 = vrot.slane %v412_v5, 2 }
 0x104   : > { %vm414_vm8 = vcmp.lt.s32.totalorder %v412_v5, %v413_v21 }
 0x105   : > { %v415_v16 = vsel %vm414_vm8, %v412_v5, %v413_v21 }
 0x106   : > { %v416_v23 = vrot.slane %v415_v16, 1 }
 0x108   : > { %vm417_vm4 = vcmp.lt.s32.totalorder %v415_v16, %v416_v23 }
 0x109   : > { %v418_v24 = vsel %vm417_vm4, %v415_v16, %v416_v23 }
 0x10a   : > { %v419_v25 = vand.u32 4294967288, %v418_v24 }
 0x10c   : > { %v423_v26 = vmul.f32 %v419_v25, %v419_v25 }
 0x10e   : > { %v424_v2 = vsel %vm422_vm7, %v423_v26, 0.0 }
 0x10f   : > { %v425_v27 = vadd.f32 %v424_v2, %v399_v14 }
 0x111   : > { %426 = vst [vmem:[%s194_s14] sm:$0x1] %v425_v27 }
 0x112   : > { %667 = shalt.err (!%p664_p1)
}
 0x113   : > { %s668_s26 = scalar_lea.hbm %s1009_s24, 16  ;;  %s672_s6 = scalar_lea.hbm %s1055_s2, 32 }
 0x114   : > { %p669_p11 = scmp.ne.s32.totalorder %s1009_s24, %s668_s26  ;;  %p673_p4 = scmp.lt.u32.totalorder %s1009_s24, %s1055_s2 }
 0x115   : > { %p674_p10 = scmp.lt.u32.totalorder %s672_s6, %s668_s26  ;;  %p676_p6 = scmp.lt.u32.totalorder %s668_s26, %s1009_s24 }
 0x116   : > { %p670_p12 = pnand %p669_p11, %p1080_p13 }
 0x117   : > { %p675_p3 = por %p674_p10, %p673_p4 }
 0x118   : > { %p671_p2 = pneg %p670_p12 }
 0x119   : > { %p677_p7 = por %p676_p6, %p675_p3 }
 0x11b   : > { %p678_p5 = pnand %p677_p7, %p671_p2 }
 0x11d   : > { %681 = shalt.err (!%p678_p5)
}
 0x11e   : > { %547 = dma.vmem_to_hbm [thread:$0]  (%p1080_p13), %s1011_s28, 16, %s1009_s24, %s428_s17  }
 0x11f PF: > { %s452_s3 = sand.u32 1, %s712_s9   ;;  %p1081_p8 = scmp.ne.s32.totalorder %s1061_s22, 0 }
 0x120   : > { %p1082_p9 = scmp.ge.s32.totalorder %s724_s12, 2  ;;  %s453_s7 = scalar_lea.sflag [#allocation4], %s452_s3 }
 0x122   : > { %p557_p0 = pnand %p1082_p9, %p1081_p8 }
 0x124   : > { %707 = dma.done.wait (!%p557_p0), %s453_s7, 16  }
 0x125   : > { %709 = vsyncadd (!%p557_p0), %s453_s7, 4294967280  ;;  %p18_p1 = scmp.ge.s32.totalorder %s769_s15, 4   ;;  %s1083_s9 = smov %s716_s10 }
 0x126   : > { %s1084_s10 = smov %s720_s11  ;;  %s1085_s11 = smov %s781_s18 }
 0x127   : > { %s1086_s12 = smov %s769_s15  ;;  %20 = sbr.rel (!%p18_p1) target bundleno = 7 (0x7), region = 86 }
 0x12e   :  { %457 = vsyncpa [#allocation3], 1 }
 0x12f   :  { %459 = vsyncpa [#allocation3 + $0x1], 1 }
 0x130   :  { %460 = vsyncpa [#allocation6], 1 }
 0x131   :  { %462 = vsyncpa [#allocation6 + $0x1], 1 }
 0x132   :  { %463 = vsyncpa [#allocation4], 1 }
 0x133   :  { %465 = vsyncpa [#allocation4 + $0x1], 1 }

</bundles_post_ra>
